<compile_context>
chip_gen: v7x
topology: tpu7x:2x2x1
jax: 0.10.0
libtpu: 0.0.40
codegen_flags: <defaults>
</compile_context>

<pallas_src>
import functools
import math

import jax
import jax.numpy as jnp
from jax.experimental import pallas as pl
from jax.experimental.pallas import tpu as pltpu

_NEG_SLOPE = 0.2
_MASK_VAL = -1e30
# v7x physical VMEM is 64 MiB; keep headroom for double-buffered inputs.
_VMEM_LIMIT = 48 * 1024 * 1024


def _round_up(x, m):
    return -(-x // m) * m


def _lcm(a, b):
    return a * b // math.gcd(a, b)


def _bf16_exp_supported():
    # v5e has no bf16 EUP/VPU: bf16 exp would only add casts there.
    try:
        kind = jax.devices()[0].device_kind.lower()
    except Exception:
        return True
    return "v5" not in kind


def _choose_tiles(n, tm=None, tn=None):
    """Pick (tm, tn, n_pad). Pads N instead of falling back to a 1x1 grid."""
    n128 = _round_up(max(n, 128), 128)
    if tn is None:
        tn = 128
        for c in (512, 256, 128):          # TN >= 256 fills the v6e/v7x MXU depth.
            if c <= n128:
                tn = c
                break
    if tm is None:
        tm = min(256, tn)
        # v7x has 2 TensorCores; keep >= 2 blocks on the "parallel" row axis.
        while tm > 128 and _round_up(n128, _lcm(tm, tn)) // tm < 2:
            tm //= 2
    n_pad = _round_up(n128, _lcm(tm, tn))
    assert n_pad % tm == 0 and n_pad % tn == 0
    return tm, tn, n_pad


# ---------------------------------------------------------------------------
# Kernel 1: fused linear projection + per-head attention scalars.
# ---------------------------------------------------------------------------
def _project_kernel(x_ref, w_ref, a_ref, h_ref, s_ref, d_ref, *, heads,
                    apply_elu):
    x = x_ref[...]
    if apply_elu:
        # F.elu fused here (runs O(N*F), outside the N^2 attention kernel).
        x = jnp.where(x > 0, x, jnp.expm1(x))
    x = x.astype(jnp.bfloat16)
    h = jnp.dot(x, w_ref[...], preferred_element_type=jnp.float32)      # (TM, H*Fh)
    h_bf = h.astype(jnp.bfloat16)
    # [s_all | d_all] for ALL heads in one MXU matmul (block-diagonal A).
    sd = jnp.dot(h_bf, a_ref[...], preferred_element_type=jnp.float32)  # (TM, 2H)
    h_ref[...] = h_bf
    s_ref[...] = sd[:, :heads]
    d_ref[...] = sd[:, heads:]


def gat_project(x, w_bf16, attn_mat_bf16, *, heads, apply_elu, tm):
    n, f_in = x.shape
    d_feat = w_bf16.shape[1]
    kernel = functools.partial(_project_kernel, heads=heads, apply_elu=apply_elu)
    return pl.pallas_call(
        kernel,
        out_shape=(jax.ShapeDtypeStruct((n, d_feat), jnp.bfloat16),
                   jax.ShapeDtypeStruct((n, heads), jnp.float32),
                   jax.ShapeDtypeStruct((n, heads), jnp.float32)),
        grid_spec=pltpu.PrefetchScalarGridSpec(
            num_scalar_prefetch=0,
            grid=(n // tm,),
            in_specs=[
                pl.BlockSpec((tm, f_in), lambda i: (i, 0)),
                pl.BlockSpec((f_in, d_feat), lambda i: (0, 0)),
                pl.BlockSpec((d_feat, 2 * heads), lambda i: (0, 0)),
            ],
            out_specs=(
                pl.BlockSpec((tm, d_feat), lambda i: (i, 0)),
                pl.BlockSpec((tm, heads), lambda i: (i, 0)),
                pl.BlockSpec((tm, heads), lambda i: (i, 0)),
            )),
        compiler_params=pltpu.CompilerParams(
            dimension_semantics=("parallel",),
            vmem_limit_bytes=_VMEM_LIMIT),
    )(x, w_bf16, attn_mat_bf16)


# ---------------------------------------------------------------------------
# Kernel 2: tiled attention with online softmax over source blocks.
# ---------------------------------------------------------------------------
def _gat_attn_kernel(d_ref, sT_ref, h_ref, adj_ref, bias_ref, out_ref,
                     m_scr, l_scr, acc_scr, *, heads, out_dim, concat,
                     bf16_exp):
    # NOTE: rows whose neighbors all lie in later j blocks carry m = -1e30 and
    # accumulate p = exp(0) = 1 garbage until a real neighbor arrives; the
    # alpha = exp(-1e30 - m_real) = 0 rescale cancels it. This relies on every
    # REAL row having >= 1 neighbor (guaranteed by the self-loop). Padded rows
    # never see a neighbor; their (finite) garbage is sliced off by the caller.
    j = pl.program_id(1)

    @pl.when(j == 0)
    def _():
        m_scr[...] = jnp.full_like(m_scr, _MASK_VAL)
        l_scr[...] = jnp.zeros_like(l_scr)
        acc_scr[...] = jnp.zeros_like(acc_scr)

    nbr = adj_ref[...] > 0                      # (TM, TN) mask, hoisted out of head loop
    d_all = d_ref[...]                          # (TM, H)  f32 (dst scores)
    sT_all = sT_ref[...]                        # (H, TN)  f32 (src scores, transposed)
    h_blk = h_ref[...]                          # (TN, H*Fh) bf16

    # Static head unroll; each head's running stats are written directly into
    # their scratch slice (no per-step lane concatenation of sub-vreg pieces).
    for hd in range(heads):
        e = d_all[:, hd:hd + 1] + sT_all[hd:hd + 1, :]          # (TM, TN) f32
        e = jnp.where(e > 0, e, _NEG_SLOPE * e)                 # LeakyReLU
        e = jnp.where(nbr, e, _MASK_VAL)                        # adjacency mask

        m_prev = m_scr[:, hd:hd + 1]                            # (TM, 1)
        m_new = jnp.maximum(m_prev, jnp.max(e, axis=-1, keepdims=True))
        alpha = jnp.exp(m_prev - m_new)                         # (TM, 1) f32

        if bf16_exp:
            # bf16 exp on the EUP (v6e/v7x); l/m bookkeeping stays f32.
            p = jnp.exp((e - m_new).astype(jnp.bfloat16))       # (TM, TN) bf16
            p_sum = jnp.sum(p, axis=-1, keepdims=True, dtype=jnp.float32)
            p_mm = p
        else:
            p = jnp.exp(e - m_new)                              # (TM, TN) f32
            p_sum = jnp.sum(p, axis=-1, keepdims=True)
            p_mm = p.astype(jnp.bfloat16)

        hh = h_blk[:, hd * out_dim:(hd + 1) * out_dim]          # (TN, Fh) bf16
        acc_prev = acc_scr[:, hd * out_dim:(hd + 1) * out_dim]  # (TM, Fh) f32

        m_scr[:, hd:hd + 1] = m_new
        l_scr[:, hd:hd + 1] = alpha * l_scr[:, hd:hd + 1] + p_sum
        acc_scr[:, hd * out_dim:(hd + 1) * out_dim] = (
            alpha * acc_prev
            + jnp.dot(p_mm, hh, preferred_element_type=jnp.float32))

    @pl.when(j == pl.num_programs(1) - 1)
    def _():
        inv_l = pl.reciprocal(l_scr[...], approx=True)          # (TM, H)
        acc = acc_scr[...]
        outs = [acc[:, hd * out_dim:(hd + 1) * out_dim] * inv_l[:, hd:hd + 1]
                for hd in range(heads)]
        if concat:
            out = jnp.concatenate(outs, axis=-1)                # (TM, H*Fh)
        else:
            out = outs[0]
            for t in outs[1:]:
                out = out + t
            out = out * (1.0 / heads)                           # (TM, Fh)
        out_ref[...] = out + bias_ref[...]


def gat_attention(d_all, sT, h_bf16, adj, bias, *, heads, out_dim, concat,
                  tm, tn, bf16_exp):
    n = d_all.shape[0]
    d_feat = heads * out_dim
    d_out = d_feat if concat else out_dim
    kernel = functools.partial(_gat_attn_kernel, heads=heads, out_dim=out_dim,
                               concat=concat, bf16_exp=bf16_exp)
    return pl.pallas_call(
        kernel,
        out_shape=jax.ShapeDtypeStruct((n, d_out), jnp.float32),
        grid_spec=pltpu.PrefetchScalarGridSpec(
            num_scalar_prefetch=0,
            grid=(n // tm, n // tn),
            in_specs=[
                pl.BlockSpec((tm, heads), lambda i, j: (i, 0)),      # dst scores
                pl.BlockSpec((heads, tn), lambda i, j: (0, j)),      # src scores (T)
                pl.BlockSpec((tn, d_feat), lambda i, j: (j, 0)),     # h (bf16)
                pl.BlockSpec((tm, tn), lambda i, j: (i, j)),         # adjacency (int8)
                pl.BlockSpec((1, d_out), lambda i, j: (0, 0)),       # bias
            ],
            out_specs=pl.BlockSpec((tm, d_out), lambda i, j: (i, 0)),
            scratch_shapes=[
                pltpu.VMEM((tm, heads), jnp.float32),   # running max
                pltpu.VMEM((tm, heads), jnp.float32),   # running sum
                pltpu.VMEM((tm, d_feat), jnp.float32),  # accumulator
            ]),
        compiler_params=pltpu.CompilerParams(
            dimension_semantics=("parallel", "arbitrary"),
            vmem_limit_bytes=_VMEM_LIMIT),
    )(d_all, sT, h_bf16, adj, bias.reshape(1, -1))


# ---------------------------------------------------------------------------
# Wrappers.
# ---------------------------------------------------------------------------
def _build_attn_matrix(a_src, a_dst):
    """Block-diagonal (H*Fh, 2H) matrix so that h @ A = [s_all | d_all]."""
    h, f = a_src.shape
    m = jnp.zeros((h * f, 2 * h), jnp.float32)
    for hd in range(h):
        m = m.at[hd * f:(hd + 1) * f, hd].set(a_src[hd])
        m = m.at[hd * f:(hd + 1) * f, h + hd].set(a_dst[hd])
    return m


def build_adjacency(edge_index, n, n_pad=None):
    """int8 adjacency: adj[i, j] = 1 iff edge j -> i or i == j (self-loop).

    Padded rows/cols (>= n) have no edges and no self-loops.
    """
    n_pad = n if n_pad is None else n_pad
    src, dst = edge_index[0], edge_index[1]
    adj = jnp.zeros((n_pad, n_pad), jnp.int8)
    adj = adj.at[dst, src].set(1)
    idx = jnp.arange(n)
    adj = adj.at[idx, idx].set(1)
    return adj


def super_gat_conv(x, w, a_src, a_dst, bias, adj, *, heads, out_dim, concat,
                   apply_elu_to_input, tm, tn, bf16_exp):
    attn_mat = _build_attn_matrix(a_src, a_dst)
    h_bf, s, d = gat_project(x, w.astype(jnp.bfloat16),
                             attn_mat.astype(jnp.bfloat16),
                             heads=heads, apply_elu=apply_elu_to_input, tm=tm)
    # One tiny (N, H) transpose between the two pallas_calls; emitting sT
    # directly from kernel 1 would need an in-kernel (TM, H)->(H, TM) relayout
    # for a negligible HBM saving, so it is done here instead.
    sT = jnp.transpose(s)
    return gat_attention(d, sT, h_bf, adj, bias, heads=heads, out_dim=out_dim,
                         concat=concat, tm=tm, tn=tn, bf16_exp=bf16_exp)


def supergat_net_forward(x, edge_index, params, *, heads, hidden, out_heads,
                         n_classes, tm=None, tn=None):
    n = x.shape[0]
    tm, tn, n_pad = _choose_tiles(n, tm, tn)
    bf16_exp = _bf16_exp_supported()
    if n_pad != n:
        x = jnp.pad(x, ((0, n_pad - n), (0, 0)))
    adj = build_adjacency(edge_index, n, n_pad)
    # F.dropout(p, training=False) == identity, so omitted.
    x1 = super_gat_conv(x, params["w1"], params["a1_src"], params["a1_dst"],
                        params["b1"], adj, heads=heads, out_dim=hidden,
                        concat=True, apply_elu_to_input=False, tm=tm, tn=tn,
                        bf16_exp=bf16_exp)
    # F.elu + dropout(identity) fused into the second layer's projection kernel.
    x2 = super_gat_conv(x1, params["w2"], params["a2_src"], params["a2_dst"],
                        params["b2"], adj, heads=out_heads, out_dim=n_classes,
                        concat=False, apply_elu_to_input=True, tm=tm, tn=tn,
                        bf16_exp=bf16_exp)
    return x2[:n] if n_pad != n else x2


def init_params(key, f_in, hidden, heads, n_classes, out_heads):
    ks = jax.random.split(key, 8)
    glorot = jax.nn.initializers.glorot_uniform()
    return {
        "w1": glorot(ks[0], (f_in, heads * hidden), jnp.float32),
        "a1_src": glorot(ks[1], (heads, hidden), jnp.float32),
        "a1_dst": glorot(ks[2], (heads, hidden), jnp.float32),
        "b1": jnp.zeros((heads * hidden,), jnp.float32),
        "w2": glorot(ks[3], (heads * hidden, out_heads * n_classes), jnp.float32),
        "a2_src": glorot(ks[4], (out_heads, n_classes), jnp.float32),
        "a2_dst": glorot(ks[5], (out_heads, n_classes), jnp.float32),
        "b2": jnp.zeros((n_classes,), jnp.float32),
    }


# ---------------------------------------------------------------------------
# Pure-JAX reference (f32) for a correctness sanity check.
# ---------------------------------------------------------------------------
def _gat_layer_ref(x, w, a_src, a_dst, bias, adj, *, heads, out_dim, concat):
    h = jnp.dot(x, w)
    no_edge = adj == 0
    outs = []
    for hd in range(heads):
        hh = h[:, hd * out_dim:(hd + 1) * out_dim]
        s = hh @ a_src[hd]
        d = hh @ a_dst[hd]
        e = d[:, None] + s[None, :]
        e = jnp.where(e > 0, e, _NEG_SLOPE * e)
        e = jnp.where(no_edge, -jnp.inf, e)
        p = jax.nn.softmax(e, axis=-1)
        outs.append(p @ hh)
    out = jnp.concatenate(outs, -1) if concat else sum(outs) / heads
    return out + bias


def supergat_ref(x, edge_index, params, *, heads, hidden, out_heads, n_classes):
    adj = build_adjacency(edge_index, x.shape[0])
    x1 = _gat_layer_ref(x, params["w1"], params["a1_src"], params["a1_dst"],
                        params["b1"], adj, heads=heads, out_dim=hidden,
                        concat=True)
    x1 = jnp.where(x1 > 0, x1, jnp.expm1(x1))
    return _gat_layer_ref(x1, params["w2"], params["a2_src"], params["a2_dst"],
                          params["b2"], adj, heads=out_heads, out_dim=n_classes,
                          concat=False)


if __name__ == "__main__":
    # Non-divisible N exercises the padding path; TM=TN=128 gives a (3, 3) grid
    # (online softmax + multiple "parallel" row blocks) at toy size.
    N, F_IN, HIDDEN, HEADS = 300, 32, 8, 8
    OUT_HEADS, N_CLASSES, E = 8, 8, 1200
    TM, TN = 128, 128

    key = jax.random.PRNGKey(0)
    k_x, k_e, k_p = jax.random.split(key, 3)

    x = jax.random.normal(k_x, (N, F_IN), jnp.float32)
    edge_index = jax.random.randint(k_e, (2, E), 0, N, dtype=jnp.int32)
    params = init_params(k_p, F_IN, HIDDEN, HEADS, N_CLASSES, OUT_HEADS)

    out = supergat_net_forward(x, edge_index, params, heads=HEADS, hidden=HIDDEN,
                               out_heads=OUT_HEADS, n_classes=N_CLASSES,
                               tm=TM, tn=TN)
    out = jax.block_until_ready(out)
    assert out.shape == (N, N_CLASSES), out.shape
    assert bool(jnp.all(jnp.isfinite(out)))

    ref = supergat_ref(x, edge_index, params, heads=HEADS, hidden=HIDDEN,
                       out_heads=OUT_HEADS, n_classes=N_CLASSES)
    err = float(jnp.max(jnp.abs(out - ref)))
    # bf16 MXU + bf16 exp tolerance for a 2-layer network.
    assert err < 2e-1, f"max abs err vs reference: {err}"
    print("KERNEL_OK")
</pallas_src>

<mosaic_0001>
module attributes {stable_mosaic.version = 11 : i64} {
  func.func @_project_kernel(%arg0: i32, %arg1: memref<128x32xf32, #tpu.memory_space<vmem>>, %arg2: memref<32x64xbf16, #tpu.memory_space<vmem>>, %arg3: memref<64x16xbf16, #tpu.memory_space<vmem>>, %arg4: memref<128x64xbf16, #tpu.memory_space<vmem>>, %arg5: memref<128x8xf32, #tpu.memory_space<vmem>>, %arg6: memref<128x8xf32, #tpu.memory_space<vmem>>) attributes {dimension_semantics = [#tpu.dimension_semantics<parallel>], iteration_bounds = array<i64: 3>, scalar_prefetch = 0 : i64, scratch_operands = 0 : i64, tpu.core_type = #tpu.core_type<tc>, window_params = [{transform_indices = @transform_0, window_bounds = array<i64: 128, 32>}, {pipeline_mode = #tpu.pipeline_mode<synchronous>, transform_indices = @transform_1, window_bounds = array<i64: 32, 64>}, {pipeline_mode = #tpu.pipeline_mode<synchronous>, transform_indices = @transform_2, window_bounds = array<i64: 64, 16>}, {transform_indices = @transform_3, window_bounds = array<i64: 128, 64>}, {transform_indices = @transform_4, window_bounds = array<i64: 128, 8>}, {transform_indices = @transform_5, window_bounds = array<i64: 128, 8>}]} {
    %c0 = arith.constant 0 : index
    %c0_0 = arith.constant 0 : index
    %0 = vector.load %arg1[%c0, %c0_0] : memref<128x32xf32, #tpu.memory_space<vmem>>, vector<128x32xf32>
    %1 = arith.truncf %0 : vector<128x32xf32> to vector<128x32xbf16>
    %c0_1 = arith.constant 0 : index
    %c0_2 = arith.constant 0 : index
    %2 = vector.load %arg2[%c0_1, %c0_2] : memref<32x64xbf16, #tpu.memory_space<vmem>>, vector<32x64xbf16>
    %cst = arith.constant dense<0.000000e+00> : vector<128x64xf32>
    %3 = tpu.matmul %1, %2, %cst {dimension_numbers = #tpu.dot_dimension_numbers<[1], [0], [0], [1], [0, 0, 1, 1], [], []>} : vector<128x32xbf16>, vector<32x64xbf16>, vector<128x64xf32> -> vector<128x64xf32>
    %4 = arith.truncf %3 : vector<128x64xf32> to vector<128x64xbf16>
    %c0_3 = arith.constant 0 : index
    %c0_4 = arith.constant 0 : index
    %5 = vector.load %arg3[%c0_3, %c0_4] : memref<64x16xbf16, #tpu.memory_space<vmem>>, vector<64x16xbf16>
    %cst_5 = arith.constant dense<0.000000e+00> : vector<128x16xf32>
    %6 = tpu.matmul %4, %5, %cst_5 {dimension_numbers = #tpu.dot_dimension_numbers<[1], [0], [0], [1], [0, 0, 1, 1], [], []>} : vector<128x64xbf16>, vector<64x16xbf16>, vector<128x16xf32> -> vector<128x16xf32>
    %c0_6 = arith.constant 0 : index
    %c0_7 = arith.constant 0 : index
    %7 = vector.load %arg4[%c0_6, %c0_7] : memref<128x64xbf16, #tpu.memory_space<vmem>>, vector<128x64xbf16>
    tpu.vector_store %arg4[%c0_6, %c0_7], %4 {strides = array<i32>} : memref<128x64xbf16, #tpu.memory_space<vmem>>, vector<128x64xbf16>,
    %8 = vector.extract_strided_slice %6 {offsets = [0, 0], sizes = [128, 8], strides = [1, 1]} : vector<128x16xf32> to vector<128x8xf32>
    %c0_8 = arith.constant 0 : index
    %c0_9 = arith.constant 0 : index
    %9 = vector.load %arg5[%c0_8, %c0_9] : memref<128x8xf32, #tpu.memory_space<vmem>>, vector<128x8xf32>
    tpu.vector_store %arg5[%c0_8, %c0_9], %8 {strides = array<i32>} : memref<128x8xf32, #tpu.memory_space<vmem>>, vector<128x8xf32>,
    %10 = vector.extract_strided_slice %6 {offsets = [0, 8], sizes = [128, 8], strides = [1, 1]} : vector<128x16xf32> to vector<128x8xf32>
    %c0_10 = arith.constant 0 : index
    %c0_11 = arith.constant 0 : index
    %11 = vector.load %arg6[%c0_10, %c0_11] : memref<128x8xf32, #tpu.memory_space<vmem>>, vector<128x8xf32>
    tpu.vector_store %arg6[%c0_10, %c0_11], %10 {strides = array<i32>} : memref<128x8xf32, #tpu.memory_space<vmem>>, vector<128x8xf32>,
    return
  }
  func.func @transform_0(%arg0: i32) -> (i32, i32) {
    %c0_i32 = arith.constant 0 : i32
    %c0_i32_0 = arith.constant 0 : i32
    return %arg0, %c0_i32 : i32, i32
  }
  func.func @transform_1(%arg0: i32) -> (i32, i32) {
    %c0_i32 = arith.constant 0 : i32
    %c0_i32_0 = arith.constant 0 : i32
    %c0_i32_1 = arith.constant 0 : i32
    return %c0_i32, %c0_i32_0 : i32, i32
  }
  func.func @transform_2(%arg0: i32) -> (i32, i32) {
    %c0_i32 = arith.constant 0 : i32
    %c0_i32_0 = arith.constant 0 : i32
    %c0_i32_1 = arith.constant 0 : i32
    return %c0_i32, %c0_i32_0 : i32, i32
  }
  func.func @transform_3(%arg0: i32) -> (i32, i32) {
    %c0_i32 = arith.constant 0 : i32
    %c0_i32_0 = arith.constant 0 : i32
    return %arg0, %c0_i32 : i32, i32
  }
  func.func @transform_4(%arg0: i32) -> (i32, i32) {
    %c0_i32 = arith.constant 0 : i32
    %c0_i32_0 = arith.constant 0 : i32
    return %arg0, %c0_i32 : i32, i32
  }
  func.func @transform_5(%arg0: i32) -> (i32, i32) {
    %c0_i32 = arith.constant 0 : i32
    %c0_i32_0 = arith.constant 0 : i32
    return %arg0, %c0_i32 : i32, i32
  }
}

</mosaic_0001>

<bundles_post_ra>
// kernel: tpu_custom_call.1
= control target key start
LH: loop header
LB: loop body
LE: loop exit
PB: predicated region body
PF: predicated region fallthrough
CT: control target
= control target key end

     0   :  { %s1063_s18 = smov 0   ;;  %s1265_s0 = inlined_call_operand.vmem [shape: f32[384,32], index: 0, kind: input, shape index: {}]   ;;  %s1266_s1 = inlined_call_operand.vmem [shape: bf16[32,64], index: 1, kind: input, shape index: {}]   ;;  %s1267_s2 = inlined_call_operand.vmem [shape: bf16[64,16], index: 2, kind: input, shape index: {}]   ;;  %s1268_s3 = inlined_call_operand.vmem [shape: bf16[384,64], index: 3, kind: output, shape index: {0}]   ;;  %s1269_s4 = inlined_call_operand.vmem [shape: f32[384,8], index: 4, kind: output, shape index: {1}]   ;;  %s1270_s5 = inlined_call_operand.vmem [shape: f32[384,8], index: 5, kind: output, shape index: {2}]  }
   0x1 LB: > { %s874_s19 = sadd.s32 4294967295, %s1030_s18   ;;  %p878_p0 = scmp.ge.s32.totalorder %s1030_s18, 1  ;;  %s1030_s18 = sphi %s1063_s18, %s16_s18  }
   0x2   : > { %p193_p1 = scmp.lt.s32.totalorder %s1030_s18, 4 }
   0x4   : > { %p194_p2 = pnand %p878_p0, %p193_p1 }
   0x5   : > { %v1018_v0 = vld [vmem:[%s1266_s1] sm:$0xff] (!%p194_p2)   ;;  %s879_s22 = sshll.u32 (!%p194_p2), %s874_s19, 4  ;;  %v1019_v1 = vld [vmem:[%s1266_s1 + $0x8] sm:$0xff] (!%p194_p2)   ;;  %v1022_v4 = vld [vmem:[%s1267_s2 + $0x10] sm:$0xff] (!%p194_p2)   ;;  %vm296_vm0 = vcmask (!%p194_p2), 261120   ;;  %vm636_vm1 = vcmask (!%p194_p2), 519168  }
   0x6   : > { %197 = sbr.rel (%p194_p2) target bundleno = 597 (0x255), region = 32  ;;  %p232_p3 = scmp.lt.s32.totalorder (!%p194_p2), %s879_s22, 47  ;;  %965 = vmatprep.subr.bf16.mxu0 (!%p194_p2), %v1018_v0  ;;  %v1020_v2 = vld [vmem:[%s1267_s2] sm:$0xff] (!%p194_p2)   ;;  %v1021_v3 = vld [vmem:[%s1267_s2 + $0x8] sm:$0xff] (!%p194_p2)   ;;  %v1023_v29 = vld [vmem:[%s1267_s2 + $0x18] sm:$0xff] (!%p194_p2)   ;;  %vm458_vm2 = vcmask (!%p194_p2), 523264  }
   0x7   : > { %966 = vmatpush3.bf16.msra.mxu0 (!%p194_p2), %v1018_v0  ;;  %985 = vmatprep.subr.bf16.mxu1 (!%p194_p2), %v1020_v2  ;;  %vm653_vm3 = vcmask (!%p194_p2), 64512   ;;  %s1032_s20 = smov (!%p194_p2), 120  }
   0x8   : > { %967 = vmatprep.subr.bf16.mxu0 (!%p194_p2), %v1019_v1  ;;  %986 = vmatpush3.bf16.msra.mxu1 (!%p194_p2), %v1020_v2 }
   0x9   : > { %987 = vmatprep.subr.bf16.mxu1 (!%p194_p2), %v1021_v3 }
   0xb   : > { %968 = vmatpush3.bf16.msra.mxu0 (!%p194_p2), %v1019_v1 }
   0xc   : > { %988 = vmatpush3.bf16.msra.mxu1 (!%p194_p2), %v1021_v3 }
   0xd   : > { %s1272_s22 = smov (!%p232_p3, %s879_s22), 47  ;;  %989 = vmatprep.subr.bf16.mxu1 %v1022_v4 }
   0xe   : > { %s1086_s29 = sshll.u32 %s1272_s22, 3  ;;  %s882_s12 = sshll.u32 %s1272_s22, 2 }
   0xf   : > { %s1092_s7 = scalar_lea.vmem %s1265_s0, %s1086_s29  ;;  %s1128_s15 = scalar_lea.vmem %s1268_s3, %s882_s12 }
  0x10   : > { %v256_v5 = vld [vmem:[%s1092_s7] sm:$0xff]  ;;  %v257_v6 = vld [vmem:[%s1092_s7 + $0x8] sm:$0xff]  ;;  %v258_v7 = vld [vmem:[%s1092_s7 + $0x10] sm:$0xff]  ;;  %990 = vmatpush3.bf16.msra.mxu1 %v1022_v4  ;;  %s1174_s19 = scalar_lea.vmem %s1269_s4, %s1086_s29  ;;  %s1228_s23 = scalar_lea.vmem %s1270_s5, %s1086_s29 }
  0x11   : > { %v272_v8 = vpack.c.bf16 %v257_v6, %v256_v5  ;;  %v259_v9 = vld [vmem:[%s1092_s7 + $0x18] sm:$0xff]  ;;  %v260_v10 = vld [vmem:[%s1092_s7 + $0x20] sm:$0xff]  ;;  %v261_v11 = vld [vmem:[%s1092_s7 + $0x28] sm:$0xff]  ;;  %991 = vmatprep.subr.bf16.mxu1 %v1023_v29 }
  0x12   : > { %v273_v12 = vpack.c.bf16 %v259_v9, %v258_v7  ;;  %v274_v13 = vpack.c.bf16 %v261_v11, %v260_v10  ;;  %v262_v14 = vld [vmem:[%s1092_s7 + $0x30] sm:$0xff]  ;;  %v263_v15 = vld [vmem:[%s1092_s7 + $0x38] sm:$0xff]  ;;  %v264_v16 = vld [vmem:[%s1092_s7 + $0x40] sm:$0xff] }
  0x13   : > { %969 = vmatprep.mubr.msk.bf16.mxu0 %vm296_vm0, %v272_v8  ;;  %v265_v17 = vld [vmem:[%s1092_s7 + $0x48] sm:$0xff]  ;;  %v275_v18 = vpack.c.bf16 %v263_v15, %v262_v14  ;;  %v266_v20 = vld [vmem:[%s1092_s7 + $0x50] sm:$0xff]  ;;  %v267_v21 = vld [vmem:[%s1092_s7 + $0x58] sm:$0xff] }
  0x14   : > { %970 = vmatmul.mubr.msk.bf16.vlgmr.msra.gmra.mrb[0].mxu0 %vm296_vm0, %v273_v12  ;;  %v276_v19 = vpack.c.bf16 %v265_v17, %v264_v16  ;;  %v268_v22 = vld [vmem:[%s1092_s7 + $0x60] sm:$0xff]  ;;  %v269_v23 = vld [vmem:[%s1092_s7 + $0x68] sm:$0xff]  ;;  %v277_v24 = vpack.c.bf16 %v267_v21, %v266_v20  ;;  %v270_v26 = vld [vmem:[%s1092_s7 + $0x70] sm:$0xff]  ;;  %992 = vmatpush3.bf16.msra.mxu1 %v1023_v29 }
  0x15   : > { %973 = vmatprep.mubr.msk.bf16.mxu0 %vm296_vm0, %v274_v13  ;;  %v278_v25 = vpack.c.bf16 %v269_v23, %v268_v22  ;;  %v271_v27 = vld [vmem:[%s1092_s7 + $0x78] sm:$0xff] }
  0x16   : > { %v279_v28 = vpack.c.bf16 %v271_v27, %v270_v26 }
  0x1c   : > { %974 = vmatmul.mubr.msk.bf16.gmra.mrb[4].mxu0 %vm296_vm0, %v275_v18 }
  0x1d   : > { %977 = vmatprep.mubr.msk.bf16.mxu0 %vm296_vm0, %v276_v19 }
  0x24   : > { %978 = vmatmul.mubr.msk.bf16.gmra.mrb[8].mxu0 %vm296_vm0, %v277_v24 }
  0x25   : > { %981 = vmatprep.mubr.msk.bf16.mxu0 %vm296_vm0, %v278_v25 }
  0x2c   : > { %982 = vmatmul.mubr.msk.bf16.gmra.mrb[12].mxu0 %vm296_vm0, %v279_v28 }
  0xe7   : > { %v971_v30 = vpop.f32.mrb[0].mxu0 }
  0xe8   : > { %v929_v31 = vpack.c.bf16 %v971_v30, %v971_v30  ;;  %v355_v32 = vpop.f32.mrb[1].mxu0 }
  0xe9   : > { %v927_v33 = vpack.c.bf16 %v355_v32, %v355_v32  ;;  %v972_v34 = vpop.f32.mrb[2].mxu0 }
  0xea   : > { %639 = vst.msk [vmem:[%s1128_s15 + $0x8] sm:$0xf] %vm636_vm1, %v929_v31  ;;  %v419_v35 = vpack.c.bf16 %v972_v34, %v971_v30  ;;  %v930_v36 = vpack.c.bf16 %v972_v34, %v972_v34  ;;  %v358_v37 = vpop.f32.mrb[3].mxu0 }
  0xeb   : > { %637 = vst.msk [vmem:[%s1128_s15] sm:$0xf] %vm636_vm1, %v927_v33  ;;  %v928_v38 = vpack.c.bf16 %v358_v37, %v358_v37  ;;  %v418_v39 = vpack.c.bf16 %v358_v37, %v355_v32 }
  0xec   : > { %640 = vst.msk [vmem:[%s1128_s15 + $0xc] sm:$0xf] %vm636_vm1, %v930_v36 }
  0xed   : > { %638 = vst.msk [vmem:[%s1128_s15 + $0x4] sm:$0xf] %vm636_vm1, %v928_v38  ;;  %993 = vmatprep.mubr.msk.bf16.mxu1 %vm458_vm2, %v418_v39 }
  0xee   : > { %994 = vmatmul.mubr.msk.bf16.vlgmr.msra.gmra.mrb[0].mxu1 %vm458_vm2, %v419_v35 }
  0xef   : > { %v975_v40 = vpop.f32.mrb[4].mxu0 }
  0xf0   : > { %v933_v41 = vpack.c.bf16 %v975_v40, %v975_v40  ;;  %v371_v42 = vpop.f32.mrb[5].mxu0 }
  0xf1   : > { %v931_v43 = vpack.c.bf16 %v371_v42, %v371_v42  ;;  %v976_v44 = vpop.f32.mrb[6].mxu0 }
  0xf2   : > { %643 = vst.msk [vmem:[%s1128_s15 + $0x18] sm:$0xf] %vm636_vm1, %v933_v41  ;;  %v421_v45 = vpack.c.bf16 %v976_v44, %v975_v40  ;;  %v934_v46 = vpack.c.bf16 %v976_v44, %v976_v44  ;;  %v374_v47 = vpop.f32.mrb[7].mxu0 }
  0xf3   : > { %641 = vst.msk [vmem:[%s1128_s15 + $0x10] sm:$0xf] %vm636_vm1, %v931_v43  ;;  %v420_v48 = vpack.c.bf16 %v374_v47, %v371_v42  ;;  %v932_v49 = vpack.c.bf16 %v374_v47, %v374_v47 }
  0xf4   : > { %644 = vst.msk [vmem:[%s1128_s15 + $0x1c] sm:$0xf] %vm636_vm1, %v934_v46 }
  0xf5   : > { %642 = vst.msk [vmem:[%s1128_s15 + $0x14] sm:$0xf] %vm636_vm1, %v932_v49  ;;  %997 = vmatprep.mubr.msk.bf16.mxu1 %vm458_vm2, %v420_v48 }
  0xf6   : > { %998 = vmatmul.mubr.msk.bf16.gmra.mrb[4].mxu1 %vm458_vm2, %v421_v45 }
  0xf7   : > { %v979_v50 = vpop.f32.mrb[8].mxu0 }
  0xf8   : > { %v937_v51 = vpack.c.bf16 %v979_v50, %v979_v50  ;;  %v387_v52 = vpop.f32.mrb[9].mxu0 }
  0xf9   : > { %v935_v53 = vpack.c.bf16 %v387_v52, %v387_v52  ;;  %v980_v54 = vpop.f32.mrb[10].mxu0 }
  0xfa   : > { %647 = vst.msk [vmem:[%s1128_s15 + $0x28] sm:$0xf] %vm636_vm1, %v937_v51  ;;  %v423_v55 = vpack.c.bf16 %v980_v54, %v979_v50  ;;  %v938_v56 = vpack.c.bf16 %v980_v54, %v980_v54  ;;  %v390_v57 = vpop.f32.mrb[11].mxu0 }
  0xfb   : > { %645 = vst.msk [vmem:[%s1128_s15 + $0x20] sm:$0xf] %vm636_vm1, %v935_v53  ;;  %v422_v58 = vpack.c.bf16 %v390_v57, %v387_v52  ;;  %v936_v59 = vpack.c.bf16 %v390_v57, %v390_v57 }
  0xfc   : > { %648 = vst.msk [vmem:[%s1128_s15 + $0x2c] sm:$0xf] %vm636_vm1, %v938_v56 }
  0xfd   : > { %646 = vst.msk [vmem:[%s1128_s15 + $0x24] sm:$0xf] %vm636_vm1, %v936_v59  ;;  %1001 = vmatprep.mubr.msk.bf16.mxu1 %vm458_vm2, %v422_v58 }
  0xfe   : > { %1002 = vmatmul.mubr.msk.bf16.gmra.mrb[8].mxu1 %vm458_vm2, %v423_v55 }
  0xff   : > { %v983_v60 = vpop.f32.mrb[12].mxu0 }
 0x100   : > { %v941_v61 = vpack.c.bf16 %v983_v60, %v983_v60  ;;  %v403_v62 = vpop.f32.mrb[13].mxu0 }
 0x101   : > { %v939_v63 = vpack.c.bf16 %v403_v62, %v403_v62  ;;  %v984_v0 = vpop.f32.mrb[14].mxu0 }
 0x102   : > { %651 = vst.msk [vmem:[%s1128_s15 + $0x38] sm:$0xf] %vm636_vm1, %v941_v61  ;;  %v425_v1 = vpack.c.bf16 %v984_v0, %v983_v60  ;;  %v942_v2 = vpack.c.bf16 %v984_v0, %v984_v0  ;;  %v406_v3 = vpop.f32.mrb[15].mxu0 }
 0x103   : > { %649 = vst.msk [vmem:[%s1128_s15 + $0x30] sm:$0xf] %vm636_vm1, %v939_v63  ;;  %v424_v4 = vpack.c.bf16 %v406_v3, %v403_v62  ;;  %v940_v5 = vpack.c.bf16 %v406_v3, %v406_v3 }
 0x104   : > { %652 = vst.msk [vmem:[%s1128_s15 + $0x3c] sm:$0xf] %vm636_vm1, %v942_v2 }
 0x105   : > { %650 = vst.msk [vmem:[%s1128_s15 + $0x34] sm:$0xf] %vm636_vm1, %v940_v5  ;;  %1005 = vmatprep.mubr.msk.bf16.mxu1 %vm458_vm2, %v424_v4 }
 0x106   : > { %1006 = vmatmul.mubr.msk.bf16.gmra.mrb[12].mxu1 %vm458_vm2, %v425_v1 }
 0x1c1   : > { %v995_v6 = vpop.f32.mrb[0].mxu1 }
 0x1c2   : > { %656 = vst.msk [vmem:[%s1174_s19 + $0x10] sm:$0xff] %vm653_vm3, %v995_v6  ;;  %690 = vrot.lane.b32.xlu1 %v995_v6, %s1032_s20  ;;  %v517_v7 = vpop.f32.mrb[1].mxu1 }
 0x1c3   : > { %654 = vst.msk [vmem:[%s1174_s19] sm:$0xff] %vm653_vm3, %v517_v7  ;;  %686 = vrot.lane.b32.xlu0 %v517_v7, %s1032_s20  ;;  %v996_v8 = vpop.f32.mrb[2].mxu1 }
 0x1c4   : > { %657 = vst.msk [vmem:[%s1174_s19 + $0x18] sm:$0xff] %vm653_vm3, %v996_v8  ;;  %v520_v9 = vpop.f32.mrb[3].mxu1 }
 0x1c5   : > { %655 = vst.msk [vmem:[%s1174_s19 + $0x8] sm:$0xff] %vm653_vm3, %v520_v9 }
 0x1c6   : > { %692 = vrot.lane.b32.xlu1 %v996_v8, %s1032_s20 }
 0x1c7   : > { %688 = vrot.lane.b32.xlu0 %v520_v9, %s1032_s20 }
 0x1c9   : > { %v999_v10 = vpop.f32.mrb[4].mxu1 }
 0x1ca   : > { %660 = vst.msk [vmem:[%s1174_s19 + $0x30] sm:$0xff] %vm653_vm3, %v999_v10  ;;  %v533_v11 = vpop.f32.mrb[5].mxu1 }
 0x1cb   : > { %658 = vst.msk [vmem:[%s1174_s19 + $0x20] sm:$0xff] %vm653_vm3, %v533_v11  ;;  %698 = vrot.lane.b32.xlu0 %v999_v10, %s1032_s20  ;;  %v1000_v12 = vpop.f32.mrb[6].mxu1 }
 0x1cc   : > { %661 = vst.msk [vmem:[%s1174_s19 + $0x38] sm:$0xff] %vm653_vm3, %v1000_v12  ;;  %700 = vrot.lane.b32.xlu1 %v1000_v12, %s1032_s20  ;;  %v536_v13 = vpop.f32.mrb[7].mxu1 }
 0x1cd   : > { %659 = vst.msk [vmem:[%s1174_s19 + $0x28] sm:$0xff] %vm653_vm3, %v536_v13 }
 0x1cf   : > { %694 = vrot.lane.b32.xlu0 %v533_v11, %s1032_s20 }
 0x1d0   : > { %696 = vrot.lane.b32.xlu1 %v536_v13, %s1032_s20 }
 0x1d1   : > { %v1003_v14 = vpop.f32.mrb[8].mxu1 }
 0x1d2   : > { %664 = vst.msk [vmem:[%s1174_s19 + $0x50] sm:$0xff] %vm653_vm3, %v1003_v14  ;;  %v549_v15 = vpop.f32.mrb[9].mxu1 }
 0x1d3   : > { %662 = vst.msk [vmem:[%s1174_s19 + $0x40] sm:$0xff] %vm653_vm3, %v549_v15  ;;  %706 = vrot.lane.b32.xlu0 %v1003_v14, %s1032_s20  ;;  %v1004_v16 = vpop.f32.mrb[10].mxu1 }
 0x1d4   : > { %665 = vst.msk [vmem:[%s1174_s19 + $0x58] sm:$0xff] %vm653_vm3, %v1004_v16  ;;  %708 = vrot.lane.b32.xlu1 %v1004_v16, %s1032_s20  ;;  %v552_v17 = vpop.f32.mrb[11].mxu1 }
 0x1d5   : > { %663 = vst.msk [vmem:[%s1174_s19 + $0x48] sm:$0xff] %vm653_vm3, %v552_v17 }
 0x1d7   : > { %702 = vrot.lane.b32.xlu0 %v549_v15, %s1032_s20 }
 0x1d8   : > { %704 = vrot.lane.b32.xlu1 %v552_v17, %s1032_s20 }
 0x1d9   : > { %v1007_v18 = vpop.f32.mrb[12].mxu1 }
 0x1da   : > { %668 = vst.msk [vmem:[%s1174_s19 + $0x70] sm:$0xff] %vm653_vm3, %v1007_v18  ;;  %v565_v19 = vpop.f32.mrb[13].mxu1 }
 0x1db   : > { %666 = vst.msk [vmem:[%s1174_s19 + $0x60] sm:$0xff] %vm653_vm3, %v565_v19  ;;  %710 = vrot.lane.b32.xlu0 %v565_v19, %s1032_s20  ;;  %v1008_v20 = vpop.f32.mrb[14].mxu1 }
 0x1dc   : > { %669 = vst.msk [vmem:[%s1174_s19 + $0x78] sm:$0xff] %vm653_vm3, %v1008_v20  ;;  %v568_v21 = vpop.f32.mrb[15].mxu1 }
 0x1dd   : > { %667 = vst.msk [vmem:[%s1174_s19 + $0x68] sm:$0xff] %vm653_vm3, %v568_v21  ;;  %712 = vrot.lane.b32.xlu1 %v568_v21, %s1032_s20 }
 0x1df   : > { %714 = vrot.lane.b32.xlu0 %v1007_v18, %s1032_s20 }
 0x1e1   : > { %716 = vrot.lane.b32.xlu1 %v1008_v20, %s1032_s20 }
 0x234   : > { %v691_v22 = vpop.permute.xlu1 %690 }
 0x235   : > { %736 = vst.msk [vmem:[%s1228_s23 + $0x10] sm:$0xff] %vm653_vm3, %v691_v22  ;;  %v687_v23 = vpop.permute.xlu0 %686 }
 0x236   : > { %734 = vst.msk [vmem:[%s1228_s23] sm:$0xff] %vm653_vm3, %v687_v23 }
 0x238   : > { %v693_v24 = vpop.permute.xlu1 %692 }
 0x239   : > { %737 = vst.msk [vmem:[%s1228_s23 + $0x18] sm:$0xff] %vm653_vm3, %v693_v24  ;;  %v689_v25 = vpop.permute.xlu0 %688 }
 0x23a   : > { %735 = vst.msk [vmem:[%s1228_s23 + $0x8] sm:$0xff] %vm653_vm3, %v689_v25 }
 0x23d   : > { %v699_v26 = vpop.permute.xlu0 %698 }
 0x23e   : > { %740 = vst.msk [vmem:[%s1228_s23 + $0x30] sm:$0xff] %vm653_vm3, %v699_v26  ;;  %v701_v27 = vpop.permute.xlu1 %700 }
 0x23f   : > { %741 = vst.msk [vmem:[%s1228_s23 + $0x38] sm:$0xff] %vm653_vm3, %v701_v27 }
 0x241   : > { %v695_v28 = vpop.permute.xlu0 %694 }
 0x242   : > { %738 = vst.msk [vmem:[%s1228_s23 + $0x20] sm:$0xff] %vm653_vm3, %v695_v28  ;;  %v697_v29 = vpop.permute.xlu1 %696 }
 0x243   : > { %739 = vst.msk [vmem:[%s1228_s23 + $0x28] sm:$0xff] %vm653_vm3, %v697_v29 }
 0x245   : > { %v707_v30 = vpop.permute.xlu0 %706 }
 0x246   : > { %744 = vst.msk [vmem:[%s1228_s23 + $0x50] sm:$0xff] %vm653_vm3, %v707_v30  ;;  %v709_v31 = vpop.permute.xlu1 %708 }
 0x247   : > { %745 = vst.msk [vmem:[%s1228_s23 + $0x58] sm:$0xff] %vm653_vm3, %v709_v31 }
 0x249   : > { %v703_v32 = vpop.permute.xlu0 %702 }
 0x24a   : > { %742 = vst.msk [vmem:[%s1228_s23 + $0x40] sm:$0xff] %vm653_vm3, %v703_v32  ;;  %v705_v33 = vpop.permute.xlu1 %704 }
 0x24b   : > { %743 = vst.msk [vmem:[%s1228_s23 + $0x48] sm:$0xff] %vm653_vm3, %v705_v33 }
 0x24d   : > { %v711_v34 = vpop.permute.xlu0 %710 }
 0x24e   : > { %746 = vst.msk [vmem:[%s1228_s23 + $0x60] sm:$0xff] %vm653_vm3, %v711_v34 }
 0x24f   : > { %v713_v35 = vpop.permute.xlu1 %712 }
 0x250   : > { %747 = vst.msk [vmem:[%s1228_s23 + $0x68] sm:$0xff] %vm653_vm3, %v713_v35 }
 0x251   : > { %v715_v36 = vpop.permute.xlu0 %714 }
 0x252   : > { %748 = vst.msk [vmem:[%s1228_s23 + $0x70] sm:$0xff] %vm653_vm3, %v715_v36 }
 0x253   : > { %v717_v37 = vpop.permute.xlu1 %716 }
 0x254   : > { %749 = vst.msk [vmem:[%s1228_s23 + $0x78] sm:$0xff] %vm653_vm3, %v717_v37 }
 0x255 PF: > { %s16_s18 = sadd.s32 1, %s1030_s18  }
 0x256   : > { %p13_p4 = scmp.ge.s32.totalorder %s16_s18, 5  }
 0x258   :  { %15 = sbr.rel (!%p13_p4) target bundleno = 1 (0x1), region = 86 }

</bundles_post_ra>
